<compile_context>
chip_gen: v5e
topology: v5e:2x2
jax: 0.10.0
libtpu: 0.0.40
codegen_flags: <defaults>
</compile_context>

<pallas_src>
import jax
import jax.numpy as jnp
from jax.experimental import pallas as pl
from jax.experimental.pallas import tpu as pltpu


def film_kernel(x_ref, cond_ref, wgb_ref, bgb_ref, out_ref):
    """One batch tile of FiLM: out = x * gamma' + beta  (gamma' = 1 + gamma)."""
    H = x_ref.shape[1]
    # Single fused projection: (TILE_B, C) @ (C, 2H) -> (TILE_B, 2H)
    gb = (
        jnp.dot(cond_ref[...], wgb_ref[...], preferred_element_type=jnp.float32)
        + bgb_ref[...]
    )
    gamma = gb[:, :H]          # lane-aligned slice (H is a multiple of 128)
    beta = gb[:, H:]
    out_ref[...] = (x_ref[...] * gamma + beta).astype(out_ref.dtype)


def _pick_tile_b(B, target=256):
    """Largest batch tile <= target that divides B (multiple of 8 preferred)."""
    if B <= target:
        return B
    for t in (target, 128, 64, 32, 16, 8):
        if B % t == 0:
            return t
    return min(B, target)  # ragged batch handled by padding in the wrapper


def film_forward(params, x, cond, *, tile_b=None):
    """Pallas FiLM forward. params use PyTorch Linear convention W:(out,in)."""
    B, H = x.shape
    C = cond.shape[1]
    out_dtype = x.dtype

    # Fuse gamma/beta params: Wgb (C, 2H), bgb (1, 2H). Fold the FiLM "+1"
    # into the gamma bias so the kernel computes x*gamma' + beta directly.
    wgb = jnp.concatenate(
        [jnp.transpose(params["gamma_w"]), jnp.transpose(params["beta_w"])], axis=1
    ).astype(jnp.float32)
    bgb = jnp.concatenate([params["gamma_b"] + 1.0, params["beta_b"]]).reshape(1, 2 * H)
    bgb = bgb.astype(jnp.float32)

    x = x.astype(jnp.float32)
    cond = cond.astype(jnp.float32)

    if tile_b is None:
        tile_b = _pick_tile_b(B)

    # Pad ragged batches up to a multiple of the batch tile.
    B_pad = ((B + tile_b - 1) // tile_b) * tile_b
    if B_pad != B:
        x = jnp.pad(x, ((0, B_pad - B), (0, 0)))
        cond = jnp.pad(cond, ((0, B_pad - B), (0, 0)))
    grid = (B_pad // tile_b,)

    out = pl.pallas_call(
        film_kernel,
        out_shape=jax.ShapeDtypeStruct((B_pad, H), jnp.float32),
        grid_spec=pltpu.PrefetchScalarGridSpec(
            num_scalar_prefetch=0,
            grid=grid,
            in_specs=[
                pl.BlockSpec((tile_b, H), lambda i: (i, 0)),    # x tile
                pl.BlockSpec((tile_b, C), lambda i: (i, 0)),    # cond tile
                pl.BlockSpec((C, 2 * H), lambda i: (0, 0)),     # fused weights (resident)
                pl.BlockSpec((1, 2 * H), lambda i: (0, 0)),     # fused biases  (resident)
            ],
            out_specs=pl.BlockSpec((tile_b, H), lambda i: (i, 0)),
        ),
        compiler_params=pltpu.CompilerParams(
            dimension_semantics=("parallel",)                   # megacore split on v7x
        ),
    )(x, cond, wgb, bgb)

    if B_pad != B:
        out = out[:B]
    return out.astype(out_dtype)


def init_params(key, cond_dim, hidden_dim):
    """Deterministic init mirroring nn.Linear (W stored as (out, in))."""
    ks = jax.random.split(key, 4)

    def lin(kw, kb, out_d, in_d):
        bound = 1.0 / jnp.sqrt(in_d)
        w = jax.random.uniform(kw, (out_d, in_d), jnp.float32, -bound, bound)
        b = jax.random.uniform(kb, (out_d,), jnp.float32, -bound, bound)
        return w, b

    p = {}
    p["gamma_w"], p["gamma_b"] = lin(ks[0], ks[1], hidden_dim, cond_dim)
    p["beta_w"], p["beta_b"] = lin(ks[2], ks[3], hidden_dim, cond_dim)
    return p


def reference_forward(params, x, cond):
    """Pure-JAX reference mirroring the PyTorch FiLMBlock exactly."""
    gamma = cond @ params["gamma_w"].T + params["gamma_b"]
    beta = cond @ params["beta_w"].T + params["beta_b"]
    return x * (1.0 + gamma) + beta


if __name__ == "__main__":
    # Small demo shapes consistent with the module:
    #   x: (batch, hidden_dim), cond: (batch, cond_dim)
    BATCH = 8
    COND_DIM = 16
    HIDDEN = 128   # multiple of 128 -> lane-dense output & aligned gamma/beta split

    key = jax.random.PRNGKey(0)
    kp, kx, kc = jax.random.split(key, 3)

    params = init_params(kp, COND_DIM, HIDDEN)
    x = jax.random.normal(kx, (BATCH, HIDDEN), jnp.float32)
    cond = jax.random.normal(kc, (BATCH, COND_DIM), jnp.float32)

    out = film_forward(params, x, cond)
    out = jax.block_until_ready(out)

    ref = reference_forward(params, x, cond)
    assert out.shape == (BATCH, HIDDEN), out.shape
    assert jnp.allclose(out, ref, atol=1e-4, rtol=1e-4), (
        f"max err {jnp.max(jnp.abs(out - ref))}"
    )

    print("KERNEL_OK")
</pallas_src>

<mosaic_0001>
module attributes {stable_mosaic.version = 11 : i64} {
  func.func @film_kernel(%arg0: i32, %arg1: memref<8x128xf32, #tpu.memory_space<vmem>>, %arg2: memref<8x16xf32, #tpu.memory_space<vmem>>, %arg3: memref<16x256xf32, #tpu.memory_space<vmem>>, %arg4: memref<1x256xf32, #tpu.memory_space<vmem>>, %arg5: memref<8x128xf32, #tpu.memory_space<vmem>>) attributes {dimension_semantics = [#tpu.dimension_semantics<parallel>], iteration_bounds = array<i64: 1>, scalar_prefetch = 0 : i64, scratch_operands = 0 : i64, tpu.core_type = #tpu.core_type<tc>, window_params = [{transform_indices = @transform_0, window_bounds = array<i64: 8, 128>}, {transform_indices = @transform_1, window_bounds = array<i64: 8, 16>}, {pipeline_mode = #tpu.pipeline_mode<synchronous>, transform_indices = @transform_2, window_bounds = array<i64: 16, 256>}, {pipeline_mode = #tpu.pipeline_mode<synchronous>, transform_indices = @transform_3, window_bounds = array<i64: 1, 256>}, {transform_indices = @transform_4, window_bounds = array<i64: 8, 128>}]} {
    %c0 = arith.constant 0 : index
    %c0_0 = arith.constant 0 : index
    %0 = vector.load %arg2[%c0, %c0_0] : memref<8x16xf32, #tpu.memory_space<vmem>>, vector<8x16xf32>
    %c0_1 = arith.constant 0 : index
    %c0_2 = arith.constant 0 : index
    %1 = vector.load %arg3[%c0_1, %c0_2] : memref<16x256xf32, #tpu.memory_space<vmem>>, vector<16x256xf32>
    %cst = arith.constant dense<0.000000e+00> : vector<8x256xf32>
    %2 = tpu.matmul %0, %1, %cst {dimension_numbers = #tpu.dot_dimension_numbers<[1], [0], [0], [1], [0, 0, 1, 1], [], []>} : vector<8x16xf32>, vector<16x256xf32>, vector<8x256xf32> -> vector<8x256xf32>
    %c0_3 = arith.constant 0 : index
    %c0_4 = arith.constant 0 : index
    %3 = vector.load %arg4[%c0_3, %c0_4] : memref<1x256xf32, #tpu.memory_space<vmem>>, vector<1x256xf32>
    %4 = vector.broadcast %3 : vector<1x256xf32> to vector<8x256xf32>
    %5 = arith.addf %2, %4 : vector<8x256xf32>
    %6 = vector.extract_strided_slice %5 {offsets = [0, 0], sizes = [8, 128], strides = [1, 1]} : vector<8x256xf32> to vector<8x128xf32>
    %7 = vector.extract_strided_slice %5 {offsets = [0, 128], sizes = [8, 128], strides = [1, 1]} : vector<8x256xf32> to vector<8x128xf32>
    %c0_5 = arith.constant 0 : index
    %c0_6 = arith.constant 0 : index
    %8 = vector.load %arg1[%c0_5, %c0_6] : memref<8x128xf32, #tpu.memory_space<vmem>>, vector<8x128xf32>
    %9 = arith.mulf %8, %6 : vector<8x128xf32>
    %10 = arith.addf %9, %7 : vector<8x128xf32>
    %c0_7 = arith.constant 0 : index
    %c0_8 = arith.constant 0 : index
    %11 = vector.load %arg5[%c0_7, %c0_8] : memref<8x128xf32, #tpu.memory_space<vmem>>, vector<8x128xf32>
    tpu.vector_store %arg5[%c0_7, %c0_8], %10 {strides = array<i32>} : memref<8x128xf32, #tpu.memory_space<vmem>>, vector<8x128xf32>,
    return
  }
  func.func @transform_0(%arg0: i32) -> (i32, i32) {
    %c0_i32 = arith.constant 0 : i32
    %c0_i32_0 = arith.constant 0 : i32
    return %arg0, %c0_i32 : i32, i32
  }
  func.func @transform_1(%arg0: i32) -> (i32, i32) {
    %c0_i32 = arith.constant 0 : i32
    %c0_i32_0 = arith.constant 0 : i32
    return %arg0, %c0_i32 : i32, i32
  }
  func.func @transform_2(%arg0: i32) -> (i32, i32) {
    %c0_i32 = arith.constant 0 : i32
    %c0_i32_0 = arith.constant 0 : i32
    %c0_i32_1 = arith.constant 0 : i32
    return %c0_i32, %c0_i32_0 : i32, i32
  }
  func.func @transform_3(%arg0: i32) -> (i32, i32) {
    %c0_i32 = arith.constant 0 : i32
    %c0_i32_0 = arith.constant 0 : i32
    %c0_i32_1 = arith.constant 0 : i32
    return %c0_i32, %c0_i32_0 : i32, i32
  }
  func.func @transform_4(%arg0: i32) -> (i32, i32) {
    %c0_i32 = arith.constant 0 : i32
    %c0_i32_0 = arith.constant 0 : i32
    return %arg0, %c0_i32 : i32, i32
  }
}

</mosaic_0001>

<bundles_post_ra>
// kernel: tpu_custom_call.1
= control target key start
LH: loop header
LB: loop body
LE: loop exit
PB: predicated region body
PF: predicated region fallthrough
CT: control target
= control target key end

     0   :  { %9 = vsyncpa [#allocation3], 0  ;;  %s294_s0 = inlined_call_operand.hbm [shape: f32[8,128], index: 0, kind: input, shape index: {}]   ;;  %s295_s1 = inlined_call_operand.hbm [shape: f32[8,16], index: 1, kind: input, shape index: {}]   ;;  %s296_s2 = inlined_call_operand.hbm [shape: f32[16,256], index: 2, kind: input, shape index: {}]   ;;  %s297_s3 = inlined_call_operand.vmem [shape: f32[1,256], index: 3, kind: input, shape index: {}]   ;;  %s298_s4 = inlined_call_operand.hbm [shape: f32[8,128], index: 4, kind: output, shape index: {}]  }
   0x1   :  { %10 = vsyncpa [#allocation6], 0  ;;  %s28_s17 = sshll.u32 %s295_s1, 4  ;;  %s29_s17 = int_to_ptr.hbm [resolvable:$true] %s28_s17 }
   0x2   :  { %11 = vsyncpa [#allocation4], 0  ;;  %s248_s18 = smov [#allocation5]   ;;  %s17_s22 = sshll.u32 %s294_s0, 4  ;;  %s18_s22 = int_to_ptr.hbm [resolvable:$true] %s17_s22 }
   0x3   :  { %s30_s19 = sshll.u32 %s248_s18, 4  ;;  %s249_s23 = smov [#allocation2]   ;;  %s31_s19 = int_to_ptr.vmem [resolvable:$true] %s30_s19 }
   0x4   :  { %33 = dma.hbm_to_vmem [thread:$0]  %s29_s17, 128, %s31_s19, [#allocation6]  }
   0x5   :  { %s19_s24 = sshll.u32 %s249_s23, 4  ;;  %s38_s27 = sshll.u32 %s296_s2, 4  ;;  %s20_s24 = int_to_ptr.vmem [resolvable:$true] %s19_s24  ;;  %s39_s27 = int_to_ptr.hbm [resolvable:$true] %s38_s27 }
   0x6   :  { %22 = dma.hbm_to_vmem [thread:$0]  %s18_s22, 128, %s20_s24, [#allocation3]  }
   0x7   :  { %s250_s1 = smov [#allocation7]   ;;  %s251_s29 = smov 256  }
   0x8   :  { %s40_s28 = sshll.u32 %s250_s1, 4  ;;  %s252_s30 = smov 16   ;;  %s41_s28 = int_to_ptr.vmem [resolvable:$true] %s40_s28 }
   0x9   :  { %46 = dma.hbm_to_vmem [thread:$0]  %s39_s27, 512, %s41_s28, [#allocation6], %s251_s29, %s251_s29, %s252_s30  }
   0xa   :  { %242 = dma.done.wait [#allocation3], 128  }
   0xb   :  { %243 = vsyncadd [#allocation3], 4294967168 }
   0xc   :  { %244 = dma.done.wait [#allocation6], 640  }
   0xd   :  { %245 = vsyncadd [#allocation6], 4294966656  ;;  %v64_v0 = vld [vmem:[#allocation7 + $0x10] sm:$0xff]  ;;  %v62_v1 = vld [vmem:[#allocation7] sm:$0xff]  ;;  %vm72_vm0 = vcmask 130048   ;;  %s253_s5 = smov [#allocation8]  }
   0xe   :  { %v65_v2 = vld [vmem:[#allocation7 + $0x18] sm:$0xff]  ;;  %90 = vmatpush.msra.mxu0 %v64_v0  ;;  %v63_v4 = vld [vmem:[#allocation7 + $0x8] sm:$0xff]  ;;  %v66_v5 = vld [vmem:[%s297_s3] sm:$0x3]  ;;  %s125_s6 = sshll.u32 %s253_s5, 4  ;;  %s127_s9 = sshll.u32 %s298_s4, 4  ;;  %s126_s6 = int_to_ptr.vmem [resolvable:$true] %s125_s6  ;;  %s128_s9 = int_to_ptr.hbm [resolvable:$true] %s127_s9 }
   0xf   :  { %110 = vmatpush.msra.mxu1 %v65_v2  ;;  %v61_v3 = vld [vmem:[#allocation5] sm:$0xff]  ;;  %v68_v6 = vperm.slane %v66_v5, 0  ;;  %v69_v7 = vperm.slane %v66_v5, 1  ;;  %v116_v9 = vld [vmem:[#allocation2] sm:$0xff] }
  0x10   :  { %91 = vmatpush.msra.mxu0 %v62_v1 }
  0x11   :  { %111 = vmatpush.msra.mxu1 %v63_v4  ;;  %138 = vmatmul.msk.f32.vlgmr.msra.gmra.mxu0 %vm72_vm0, %v61_v3 }
  0x12   :  { %139 = vmatmul.msk.f32.vlgmr.msra.gmra.mxu1 %vm72_vm0, %v61_v3 }
  0x8e   :  { %v93_v8 = vpop.f32.mrf.mxu0 }
  0x8f   :  { %v113_v10 = vpop.f32.mrf.mxu1  ;;  %v94_v11 = vadd.f32 %v93_v8, %v68_v6 }
  0x90   :  { %v114_v12 = vadd.f32 %v113_v10, %v69_v7 }
  0x91   :  { %v117_v13 = vmul.f32 %v116_v9, %v94_v11 }
  0x93   :  { %v118_v14 = vadd.f32 %v117_v13, %v114_v12 }
  0x95   :  { %119 = vst [vmem:[#allocation8] sm:$0xff] %v118_v14 }
  0x96   :  { %130 = dma.vmem_to_hbm [thread:$0]  %s126_s6, 128, %s128_s9, [#allocation4]  }
  0x97   :  { %246 = dma.done.wait [#allocation4], 128  }
  0x98   :  { %247 = vsyncadd [#allocation4], 4294967168 }
  0x99   :  { %135 = vsyncpa [#allocation3], 1 }
  0x9a   :  { %136 = vsyncpa [#allocation6], 1 }
  0x9b   :  { %137 = vsyncpa [#allocation4], 1 }

</bundles_post_ra>
